<compile_context>
chip_gen: v7x
topology: tpu7x:2x2x1
jax: 0.10.0
libtpu: 0.0.40
codegen_flags: <defaults>
</compile_context>

<pallas_src>
from functools import partial

import jax
import jax.numpy as jnp
from jax.experimental import pallas as pl
from jax.experimental.pallas import tpu as pltpu


# Scoped-VMEM limit requested from the compiler.  32 MiB is safe on all of
# v5e / v6e (128 MiB physical) and v7x (64 MiB physical).
_VMEM_LIMIT_BYTES = 32 * 1024 * 1024
# Budget for the per-grid-step working set (double-buffered x block +
# double-buffered output block) used when choosing the spatial tile size.
_TILE_BUDGET_BYTES = 12 * 1024 * 1024


def _choose_tile_hw(hw, height, c, itemsize, budget_bytes=_TILE_BUDGET_BYTES):
    """Largest lane-aligned divisor of `hw` whose per-step working set fits."""

    def step_bytes(t):
        # Fusion stage (the larger of the two tiled stages): 2x double-buffered
        # x block (height*C*t) + 2x double-buffered output block (C*t).
        return 2 * (height + 1) * c * t * itemsize

    if hw % 128 != 0 or step_bytes(hw) <= budget_bytes:
        # Small maps: keep the whole spatial extent resident per grid step.
        # (If hw is not lane aligned we also fall back to a single full block.)
        return hw
    candidates = [t for t in range(128, hw, 128) if hw % t == 0]
    if not candidates:
        return hw
    fitting = [t for t in candidates if step_bytes(t) <= budget_bytes]
    if fitting:
        lane_dense = [t for t in fitting if t % 512 == 0]
        return max(lane_dense) if lane_dense else max(fitting)
    return min(candidates)


def pool_kernel(x_ref, s_ref, acc_ref, *, inv_hw, height):
    # x_ref:   (1, height, C, THW)   current batch element, current spatial tile
    # s_ref:   (1, C, 1)             pooled mean output (written at last tile)
    # acc_ref: (C, 1) f32            running sum across spatial tiles
    t = pl.program_id(1)

    @pl.when(t == 0)
    def _init():
        acc_ref[...] = jnp.zeros_like(acc_ref)

    # Fused reduction over the branch axis and the spatial (lane) axis of this
    # tile; the (C, THW) feats_U intermediate is never materialized.
    tile_sum = jnp.sum(x_ref[0, 0].astype(jnp.float32), axis=-1, keepdims=True)
    for h in range(1, height):
        tile_sum = tile_sum + jnp.sum(
            x_ref[0, h].astype(jnp.float32), axis=-1, keepdims=True)
    acc_ref[...] += tile_sum

    @pl.when(t == pl.num_programs(1) - 1)
    def _finalize():
        s_ref[0] = acc_ref[...] * inv_hw


def attn_kernel(s_ref, w_du_t_ref, alpha_ref, w_fc_t_ref, att_ref, *, height):
    # s_ref:      (B, C)            pooled means, batched over B
    # w_du_t_ref: (C, d)            conv_du weight, pre-transposed
    # alpha_ref:  (1,) in SMEM      PReLU slope (single shared parameter)
    # w_fc_t_ref: (height, d, C)    per-branch fc weights, pre-transposed
    # att_ref:    (height, B, C)    softmax attention over branches
    s = s_ref[...]                                                  # (B, C)
    z = jnp.dot(s, w_du_t_ref[...], preferred_element_type=jnp.float32)  # (B, d)
    alpha = alpha_ref[0]
    z = jnp.where(z >= 0.0, z, alpha * z)                           # PReLU

    # Batched over B (M=B), so the MXU is not doing N=1 GEMVs per grid step.
    logits = [
        jnp.dot(z, w_fc_t_ref[h], preferred_element_type=jnp.float32)   # (B, C)
        for h in range(height)
    ]

    # Numerically stable softmax over the branch axis.
    m = logits[0]
    for h in range(1, height):
        m = jnp.maximum(m, logits[h])
    exps = [jnp.exp(l - m) for l in logits]
    denom = exps[0]
    for h in range(1, height):
        denom = denom + exps[h]
    # Exact divide (off the hot path, runs once per forward) to keep 1e-5
    # parity with the reference; pl.reciprocal(approx=True) would loosen it.
    inv = 1.0 / denom
    for h in range(height):
        att_ref[h] = exps[h] * inv


def fuse_kernel(x_ref, att_ref, o_ref, *, height):
    # x_ref:   (1, height, C, THW)
    # att_ref: (1, height, C, 1)    per-batch attention, broadcast along lanes
    # o_ref:   (1, C, THW)
    out = att_ref[0, 0] * x_ref[0, 0].astype(jnp.float32)
    for h in range(1, height):
        out = out + att_ref[0, h] * x_ref[0, h].astype(jnp.float32)
    o_ref[0] = out.astype(o_ref.dtype)


def skff_pallas(x_stacked, w_du, alpha, w_fc, *, tile_hw=None):
    """x_stacked: (B, height, C, HW) -> (B, C, HW)."""
    B, height, C, HW = x_stacked.shape
    itemsize = x_stacked.dtype.itemsize
    if tile_hw is None:
        tile_hw = _choose_tile_hw(HW, height, C, itemsize)
    assert HW % tile_hw == 0, "tile_hw must divide H*W"
    num_t = HW // tile_hw

    # ---- Stage 1: global average pool of sum_h x_h  -> (B, C, 1) -------------
    pooled = pl.pallas_call(
        partial(pool_kernel, inv_hw=1.0 / HW, height=height),
        out_shape=jax.ShapeDtypeStruct((B, C, 1), jnp.float32),
        grid=(B, num_t),
        in_specs=[
            pl.BlockSpec((1, height, C, tile_hw), lambda b, t: (b, 0, 0, t)),
        ],
        out_specs=pl.BlockSpec((1, C, 1), lambda b, t: (b, 0, 0)),
        scratch_shapes=[pltpu.VMEM((C, 1), jnp.float32)],
        compiler_params=pltpu.CompilerParams(
            dimension_semantics=("parallel", "arbitrary"),
            vmem_limit_bytes=_VMEM_LIMIT_BYTES),
        cost_estimate=pl.CostEstimate(
            flops=B * height * C * HW,
            transcendentals=0,
            bytes_accessed=B * height * C * HW * itemsize + B * C * 4),
    )(x_stacked)
    s = pooled.reshape(B, C)                       # tiny wrapper-side reshape

    # ---- Stage 2: branch attention weights (tiny, batched over B) ------------
    w_du_t = jnp.transpose(w_du)                   # (C, d)
    w_fc_t = jnp.transpose(w_fc, (0, 2, 1))        # (height, d, C)
    alpha_s = jnp.asarray(alpha, dtype=jnp.float32).reshape((1,))
    att_t = pl.pallas_call(
        partial(attn_kernel, height=height),
        out_shape=jax.ShapeDtypeStruct((height, B, C), jnp.float32),
        in_specs=[
            pl.BlockSpec(memory_space=pltpu.MemorySpace.VMEM),   # s
            pl.BlockSpec(memory_space=pltpu.MemorySpace.VMEM),   # w_du_t
            pl.BlockSpec(memory_space=pltpu.MemorySpace.SMEM),   # alpha (scalar)
            pl.BlockSpec(memory_space=pltpu.MemorySpace.VMEM),   # w_fc_t
        ],
        out_specs=pl.BlockSpec(memory_space=pltpu.MemorySpace.VMEM),
    )(s, w_du_t, alpha_s, w_fc_t)
    # Layout plumbing in the wrapper: present att to the fusion kernel as a
    # sublane-resident (C, 1) column per (batch, branch).
    att = jnp.transpose(att_t, (1, 0, 2)).reshape(B, height, C, 1)

    # ---- Stage 3: weighted fusion, lane-dense spatial tiles -------------------
    # (On v5e, if DMA is still exposed, pipeline_mode=pl.Buffered(3) on the x
    # BlockSpec with a slightly smaller tile is the next knob.)
    out = pl.pallas_call(
        partial(fuse_kernel, height=height),
        out_shape=jax.ShapeDtypeStruct((B, C, HW), x_stacked.dtype),
        grid=(B, num_t),
        in_specs=[
            pl.BlockSpec((1, height, C, tile_hw), lambda b, t: (b, 0, 0, t)),
            pl.BlockSpec((1, height, C, 1), lambda b, t: (b, 0, 0, 0)),
        ],
        out_specs=pl.BlockSpec((1, C, tile_hw), lambda b, t: (b, 0, t)),
        compiler_params=pltpu.CompilerParams(
            dimension_semantics=("parallel", "parallel"),
            vmem_limit_bytes=_VMEM_LIMIT_BYTES),
        cost_estimate=pl.CostEstimate(
            flops=2 * B * height * C * HW,
            transcendentals=0,
            bytes_accessed=(height + 1) * B * C * HW * itemsize
            + B * height * C * 4),
    )(x_stacked, att)
    return out


def skff_reference(inp_feats, w_du, alpha, w_fc):
    """Pure-JAX reference mirroring the PyTorch SKFF.forward."""
    x = jnp.stack(inp_feats, axis=1)                          # (B, height, C, H, W)
    feats_u = jnp.sum(x, axis=1)                              # (B, C, H, W)
    feats_s = jnp.mean(feats_u, axis=(2, 3), keepdims=True)   # (B, C, 1, 1)
    feats_z = jnp.einsum('dc,bcij->bdij', w_du, feats_s)      # (B, d, 1, 1)
    feats_z = jnp.where(feats_z >= 0, feats_z, alpha * feats_z)
    att = jnp.einsum('hcd,bdij->bhcij', w_fc, feats_z)        # (B, height, C, 1, 1)
    att = jax.nn.softmax(att, axis=1)
    return jnp.sum(x * att, axis=1)                           # (B, C, H, W)


if __name__ == "__main__":
    B, C, H, W = 2, 8, 16, 16
    height, reduction = 3, 8
    d = max(int(C / reduction), 4)

    key = jax.random.PRNGKey(0)
    k_inp, k_du, k_fc = jax.random.split(key, 3)

    # `height` input feature maps, each (B, C, H, W) — NCHW like PyTorch.
    inp_feats = [
        jax.random.normal(k, (B, C, H, W), dtype=jnp.float32)
        for k in jax.random.split(k_inp, height)
    ]

    # Synthetic parameters with the shapes from the module __init__.
    w_du = 0.1 * jax.random.normal(k_du, (d, C), dtype=jnp.float32)          # Conv2d(C,d,1), no bias
    alpha = jnp.full((1,), 0.25, dtype=jnp.float32)                          # PReLU default init
    w_fc = 0.1 * jax.random.normal(k_fc, (height, C, d), dtype=jnp.float32)  # height x Conv2d(d,C,1)

    # Pack inputs for the kernels: (B, height, C, H*W).
    x_stacked = jnp.stack(inp_feats, axis=1).reshape(B, height, C, H * W)

    ref = jax.block_until_ready(skff_reference(inp_feats, w_du, alpha, w_fc))

    # Default tile (whole spatial extent fits in one lane-dense block here).
    out = skff_pallas(x_stacked, w_du, alpha, w_fc)
    out = jax.block_until_ready(out).reshape(B, C, H, W)
    assert out.shape == (B, C, H, W)
    assert jnp.allclose(out, ref, rtol=1e-5, atol=1e-5), "mismatch vs reference"

    # Force the multi-tile spatial path (2 tiles of 128 lanes) to exercise the
    # cross-tile pooling accumulator and tiled fusion at small shapes.
    out_tiled = skff_pallas(x_stacked, w_du, alpha, w_fc, tile_hw=128)
    out_tiled = jax.block_until_ready(out_tiled).reshape(B, C, H, W)
    assert jnp.allclose(out_tiled, ref, rtol=1e-5, atol=1e-5), "tiled mismatch"

    print("KERNEL_OK")
</pallas_src>

<mosaic_0001>
module attributes {stable_mosaic.version = 11 : i64} {
  func.func @pool_kernel(%arg0: i32, %arg1: i32, %arg2: memref<1x3x8x256xf32, #tpu.memory_space<vmem>>, %arg3: memref<1x8x1xf32, #tpu.memory_space<vmem>>, %arg4: memref<8x1xf32, #tpu.memory_space<vmem>>) attributes {dimension_semantics = [#tpu.dimension_semantics<parallel>, #tpu.dimension_semantics<arbitrary>], iteration_bounds = array<i64: 2, 1>, scalar_prefetch = 0 : i64, scratch_operands = 1 : i64, tpu.core_type = #tpu.core_type<tc>, window_params = [{transform_indices = @transform_0, window_bounds = array<i64: 1, 3, 8, 256>}, {transform_indices = @transform_1, window_bounds = array<i64: 1, 8, 1>}]} {
    %c0_i32 = arith.constant 0 : i32
    %0 = arith.cmpi eq, %arg1, %c0_i32 : i32
    %1 = arith.extui %0 : i1 to i32
    %c0_i32_0 = arith.constant 0 : i32
    %2 = arith.cmpi ne, %1, %c0_i32_0 : i32
    scf.if %2 {
      %cst_18 = arith.constant 0.000000e+00 : f32
      %23 = vector.broadcast %cst_18 : f32 to vector<8x1xf32>
      %c0_19 = arith.constant 0 : index
      %c0_20 = arith.constant 0 : index
      %24 = vector.load %arg4[%c0_19, %c0_20] : memref<8x1xf32, #tpu.memory_space<vmem>>, vector<8x1xf32>
      tpu.vector_store %arg4[%c0_19, %c0_20], %23 {strides = array<i32>} : memref<8x1xf32, #tpu.memory_space<vmem>>, vector<8x1xf32>,
    } else {
    }
    %c0 = arith.constant 0 : index
    %c0_1 = arith.constant 0 : index
    %c0_2 = arith.constant 0 : index
    %c0_3 = arith.constant 0 : index
    %3 = vector.load %arg2[%c0, %c0_1, %c0_2, %c0_3] : memref<1x3x8x256xf32, #tpu.memory_space<vmem>>, vector<1x1x8x256xf32>
    %4 = vector.shape_cast %3 : vector<1x1x8x256xf32> to vector<8x256xf32>
    %cst = arith.constant dense<0.000000e+00> : vector<8xf32>
    %5 = vector.multi_reduction <add>, %4, %cst [1] : vector<8x256xf32> to vector<8xf32>
    %6 = vector.shape_cast %5 : vector<8xf32> to vector<8x1xf32>
    %c0_4 = arith.constant 0 : index
    %c1 = arith.constant 1 : index
    %c0_5 = arith.constant 0 : index
    %c0_6 = arith.constant 0 : index
    %7 = vector.load %arg2[%c0_4, %c1, %c0_5, %c0_6] : memref<1x3x8x256xf32, #tpu.memory_space<vmem>>, vector<1x1x8x256xf32>
    %8 = vector.shape_cast %7 : vector<1x1x8x256xf32> to vector<8x256xf32>
    %cst_7 = arith.constant dense<0.000000e+00> : vector<8xf32>
    %9 = vector.multi_reduction <add>, %8, %cst_7 [1] : vector<8x256xf32> to vector<8xf32>
    %10 = vector.shape_cast %9 : vector<8xf32> to vector<8x1xf32>
    %11 = arith.addf %6, %10 : vector<8x1xf32>
    %c0_8 = arith.constant 0 : index
    %c2 = arith.constant 2 : index
    %c0_9 = arith.constant 0 : index
    %c0_10 = arith.constant 0 : index
    %12 = vector.load %arg2[%c0_8, %c2, %c0_9, %c0_10] : memref<1x3x8x256xf32, #tpu.memory_space<vmem>>, vector<1x1x8x256xf32>
    %13 = vector.shape_cast %12 : vector<1x1x8x256xf32> to vector<8x256xf32>
    %cst_11 = arith.constant dense<0.000000e+00> : vector<8xf32>
    %14 = vector.multi_reduction <add>, %13, %cst_11 [1] : vector<8x256xf32> to vector<8xf32>
    %15 = vector.shape_cast %14 : vector<8xf32> to vector<8x1xf32>
    %16 = arith.addf %11, %15 : vector<8x1xf32>
    %c0_12 = arith.constant 0 : index
    %c0_13 = arith.constant 0 : index
    %17 = vector.load %arg4[%c0_12, %c0_13] : memref<8x1xf32, #tpu.memory_space<vmem>>, vector<8x1xf32>
    %18 = arith.addf %17, %16 : vector<8x1xf32>
    %c0_14 = arith.constant 0 : index
    %c0_15 = arith.constant 0 : index
    %19 = vector.load %arg4[%c0_14, %c0_15] : memref<8x1xf32, #tpu.memory_space<vmem>>, vector<8x1xf32>
    tpu.vector_store %arg4[%c0_14, %c0_15], %18 {strides = array<i32>} : memref<8x1xf32, #tpu.memory_space<vmem>>, vector<8x1xf32>,
    %c0_i32_16 = arith.constant 0 : i32
    %20 = arith.cmpi eq, %arg1, %c0_i32_16 : i32
    %21 = arith.extui %20 : i1 to i32
    %c0_i32_17 = arith.constant 0 : i32
    %22 = arith.cmpi ne, %21, %c0_i32_17 : i32
    scf.if %22 {
      %c0_18 = arith.constant 0 : index
      %c0_19 = arith.constant 0 : index
      %23 = vector.load %arg4[%c0_18, %c0_19] : memref<8x1xf32, #tpu.memory_space<vmem>>, vector<8x1xf32>
      %cst_20 = arith.constant 3.906250e-03 : f32
      %24 = vector.broadcast %cst_20 : f32 to vector<8x1xf32>
      %25 = arith.mulf %23, %24 : vector<8x1xf32>
      %c0_21 = arith.constant 0 : index
      %c0_22 = arith.constant 0 : index
      %c0_23 = arith.constant 0 : index
      %26 = vector.load %arg3[%c0_21, %c0_22, %c0_23] : memref<1x8x1xf32, #tpu.memory_space<vmem>>, vector<1x8x1xf32>
      %27 = vector.shape_cast %26 : vector<1x8x1xf32> to vector<8x1xf32>
      %28 = vector.shape_cast %25 : vector<8x1xf32> to vector<1x8x1xf32>
      tpu.vector_store %arg3[%c0_21, %c0_22, %c0_23], %28 {strides = array<i32>} : memref<1x8x1xf32, #tpu.memory_space<vmem>>, vector<1x8x1xf32>,
    } else {
    }
    return
  }
  func.func @transform_0(%arg0: i32, %arg1: i32) -> (i32, i32, i32, i32) {
    %c0_i32 = arith.constant 0 : i32
    %c0_i32_0 = arith.constant 0 : i32
    %c0_i32_1 = arith.constant 0 : i32
    return %arg0, %c0_i32, %c0_i32_0, %arg1 : i32, i32, i32, i32
  }
  func.func @transform_1(%arg0: i32, %arg1: i32) -> (i32, i32, i32) {
    %c0_i32 = arith.constant 0 : i32
    %c0_i32_0 = arith.constant 0 : i32
    %c0_i32_1 = arith.constant 0 : i32
    return %arg0, %c0_i32, %c0_i32_0 : i32, i32, i32
  }
}

</mosaic_0001>

<bundles_post_ra>
// kernel: tpu_custom_call.1
= control target key start
LH: loop header
LB: loop body
LE: loop exit
PB: predicated region body
PF: predicated region fallthrough
CT: control target
= control target key end

     0   :  { %6 = vsyncpa [#allocation4], 0  ;;  %s554_s0 = inlined_call_operand.hbm [shape: f32[2,3,8,256], index: 0, kind: input, shape index: {}]   ;;  %s555_s1 = inlined_call_operand.vmem [shape: f32[2,8,1], index: 1, kind: output, shape index: {}]  }
   0x1   :  { %8 = vsyncpa [#allocation4 + $0x1], 0  ;;  %s433_s6 = smov 0   ;;  %s435_s7 = smov 0  }
   0x2   :  { %s437_s8 = smov 0   ;;  %s439_s9 = smov 0  }
   0x3   :  { %s441_s10 = smov 0   ;;  %s443_s11 = smov 0  }
   0x4 LB: > { %s263_s12 = sadd.s32 4294967295, %s417_s11   ;;  %s26_s13 = sadd.s32 1, %s413_s10  ;;  %s417_s11 = sphi %s443_s11, %s14_s11   ;;  %s413_s10 = sphi %s441_s10, %s562_s10   ;;  %s409_s9 = sphi %s439_s9, %s561_s9   ;;  %s405_s8 = sphi %s437_s8, %s560_s8   ;;  %s401_s7 = sphi %s435_s7, %s559_s7   ;;  %s397_s6 = sphi %s433_s6, %s558_s6  }
   0x5   : > { %p28_p0 = scmp.ge.s32.totalorder %s26_s13, 2  ;;  %s35_s14 = sadd.s32 1, %s405_s8 }
   0x6   : > { %p42_p1 = scmp.ne.s32.totalorder %s405_s8, %s401_s7  ;;  %p43_p2 = scmp.eq.s32.totalorder %s417_s11, 0 }
   0x7   : > { %s564_s13 = smov (%p28_p0, %s26_s13), 0  ;;  %p48_p4 = scmp.ne.s32.totalorder %s401_s7, %s397_s6 }
   0x8   : > { %p44_p3 = por %p43_p2, %p42_p1  ;;  %s30_s15 = ssub.s32 %s413_s10, %s564_s13 }
   0x9   : > { %p49_p5 = scmp.eq.s32.totalorder %s263_s12, 0  ;;  %p33_p6 = scmp.eq.s32.totalorder %s30_s15, 0 }
   0xa   : > { %p285_p8 = scmp.lt.s32.totalorder %s417_s11, 2  ;;  %s98_s18 = sand.u32 1, %s405_s8  }
   0xb   : > { %p472_p7 = por %p49_p5, %p48_p4  ;;  %s277_s19 = smul.u32 768, %s413_s10 }
   0xc   : > { %s478_s17 = scalar_select %p33_p6, %s405_s8, %s35_s14  }
   0xd   : > { %s276_s20 = smul.u32 48, %s98_s18  ;;  %s485_s23 = scalar_lea.hbm %s554_s0, %s277_s19 }
   0xe   : > { %p487_p9 = pnand %p285_p8, %p44_p3  ;;  %s493_s27 = scalar_lea.sflag [#allocation4], %s98_s18 }
   0xf   : > { %s102_s25 = scalar_lea.vmem [#allocation3], %s276_s20  ;;  %s337_s28 = scalar_lea.hbm %s485_s23, 768 }
  0x10   : > { %s111_s26 = sshll.u32 %s102_s25, 4  ;;  %p338_p10 = scmp.ne.s32.totalorder %s485_s23, %s337_s28  ;;  %s491_s26 = int_to_ptr.vmem [resolvable:$true] %s111_s26 }
  0x11   : > { %p339_p11 = pneg %p487_p9  ;;  %s342_s2 = scalar_lea.hbm %s554_s0, 1536 }
  0x12   : > { %p343_p0 = scmp.lt.u32.totalorder %s485_s23, %s554_s0  ;;  %p344_p1 = scmp.lt.u32.totalorder %s342_s2, %s337_s28 }
  0x13   : > { %p340_p12 = pnand %p339_p11, %p338_p10  ;;  %p346_p3 = scmp.lt.u32.totalorder %s337_s28, %s485_s23 }
  0x14   : > { %p345_p2 = por %p344_p1, %p343_p0 }
  0x15   : > { %p341_p13 = pneg %p340_p12 }
  0x16   : > { %p347_p4 = por %p346_p3, %p345_p2 }
  0x18   : > { %p348_p5 = pnand %p347_p4, %p341_p13 }
  0x1a   : > { %351 = shalt.err (!%p348_p5)
}
  0x1b   : > { %s352_s5 = scalar_lea.vmem %s491_s26, 768  ;;  %s419_s6 = smov [#allocation3]  }
  0x1c   : > { %p353_p6 = scmp.ne.s32.totalorder %s491_s26, %s352_s5  ;;  %s357_s12 = sshll.u32 %s419_s6, 4  ;;  %s358_s12 = int_to_ptr.vmem [resolvable:$false] %s357_s12 }
  0x1d   : > { %s359_s14 = scalar_lea.vmem %s358_s12, 1536  ;;  %p360_p12 = scmp.lt.s32.totalorder %s491_s26, %s358_s12 }
  0x1e   : > { %p355_p8 = pnand %p353_p6, %p339_p11  ;;  %p361_p0 = scmp.lt.s32.totalorder %s359_s14, %s352_s5 }
  0x20   : > { %p356_p10 = pneg %p355_p8  ;;  %p362_p1 = por %p361_p0, %p360_p12 }
  0x22   : > { %p363_p2 = pnand %p362_p1, %p356_p10 }
  0x24   : > { %366 = shalt.err (!%p363_p2)
}
  0x25   : > { %s420_s15 = smov 256   ;;  %s421_s18 = smov 16  }
  0x26   : > { %284 = dma.hbm_to_vmem [thread:$0]  (!%p487_p9), %s485_s23, 768, %s491_s26, %s493_s27, %s420_s15, %s420_s15, %s421_s18  }
  0x27   : > { %p268_p11 = scmp.ge.s32.totalorder %s417_s11, 1  ;;  %p119_p13 = scmp.lt.s32.totalorder %s417_s11, 3 }
  0x29   : > { %p120_p3 = pnand %p268_p11, %p119_p13 }
  0x2a   : > { %s125_s19 = sand.u32 (!%p120_p3), 1, %s401_s7  }
  0x2b   : > { %123 = sbr.rel (%p120_p3) target bundleno = 217 (0xd9), region = 24  ;;  %s126_s21 = scalar_lea.sflag (!%p120_p3), [#allocation4], %s125_s19 }
  0x2c   : > { %s278_s20 = smul.u32 (!%p120_p3), 48, %s125_s19 }
  0x2e   : > { %s129_s22 = scalar_lea.vmem (!%p120_p3), [#allocation3], %s278_s20 }
  0x32   : > { %392 = dma.done.wait (%p472_p7), %s126_s21, 768  }
  0x33   : > { %394 = vsyncadd (%p472_p7), %s126_s21, 4294966528  ;;  %v158_v0 = vld [vmem:[%s129_s22] sm:$0xff]  ;;  %v159_v1 = vld [vmem:[%s129_s22 + $0x8] sm:$0xff]  ;;  %vm156_vm0 = vcmask 7168   ;;  %v422_v9 = vmov 0.0   ;;  %p148_p7 = scmp.lt.s32.totalorder %s409_s9, 1 }
  0x34   : > { %v270_v2 = vld [vmem:[%s129_s22 + $0x10] sm:$0xff]  ;;  %v160_v3 = vadd.f32 %v159_v1, %v158_v0  ;;  %v271_v4 = vld [vmem:[%s129_s22 + $0x18] sm:$0xff]  ;;  %v272_v5 = vld [vmem:[%s129_s22 + $0x20] sm:$0xff]  ;;  %157 = vst.msk [vmem:[#allocation2] sm:$0xff] %vm156_vm0, %v422_v9 }
  0x35   : > { %v273_v6 = vld [vmem:[%s129_s22 + $0x28] sm:$0xff]  ;;  %v166_v8 = vadd.f32 %v271_v4, %v270_v2  ;;  %s566_s9 = smov (!%p148_p7, %s409_s9), 1 }
  0x36   : > { %v173_v7 = vadd.f32 %v273_v6, %v272_v5  ;;  %161 = vadd.xlane.f32.xlu0 %v160_v3  ;;  %s269_s16 = sshll.u32 %s566_s9, 3 }
  0x37   : > { %s151_s25 = scalar_lea.vmem %s555_s1, %s269_s16 }
  0x38   : > { %174 = vadd.xlane.f32.xlu1 %v173_v7 }
  0x3a   : > { %167 = vadd.xlane.f32.xlu0 %v166_v8 }
  0x3b   : > { %v177_v14 = vld [vmem:[#allocation2] sm:$0xff] }
  0xc3   : > { %v162_v10 = vpop.xlane.xlu0 %161 }
  0xc5   : > { %v175_v12 = vpop.xlane.xlu1 %174 }
  0xc7   : > { %v168_v11 = vpop.xlane.xlu0 %167 }
  0xc8   : > { %v169_v13 = vadd.f32 %v168_v11, %v162_v10 }
  0xca   : > { %v176_v15 = vadd.f32 %v175_v12, %v169_v13 }
  0xcc   : > { %v178_v16 = vadd.f32 %v177_v14, %v176_v15 }
  0xce   : > { %180 = vst.msk [vmem:[#allocation2] sm:$0xff] %vm156_vm0, %v178_v16 }
  0xd5   : > { %v184_v17 = vld [vmem:[#allocation2] sm:$0xff] }
  0xd6   : > { %v185_v18 = vmul.f32 0.00390625, %v184_v17 }
  0xd8   : > { %186 = vst.msk [vmem:[%s151_s25] sm:$0xff] %vm156_vm0, %v185_v18 }
  0xd9 PF: > { %s14_s11 = sadd.s32 1, %s417_s11   ;;  %s558_s6 = smov %s401_s7 }
  0xda   : > { %p11_p9 = scmp.ge.s32.totalorder %s14_s11, 4   ;;  %s559_s7 = smov %s405_s8 }
  0xdb   : > { %s560_s8 = smov %s478_s17  ;;  %s561_s9 = smov %s413_s10 }
  0xdc   : > { %s562_s10 = smov %s564_s13  ;;  %13 = sbr.rel (!%p11_p9) target bundleno = 4 (0x4), region = 74 }
  0xe3   :  { %206 = vsyncpa [#allocation4], 1 }
  0xe4   :  { %208 = vsyncpa [#allocation4 + $0x1], 1 }

</bundles_post_ra>
